<compile_context>
chip_gen: v5e
topology: v5e:2x2
jax: 0.10.0
libtpu: 0.0.40
codegen_flags: <defaults>
</compile_context>

<pallas_src>
import functools

import jax
import jax.numpy as jnp
from jax import lax
from jax.experimental import pallas as pl
from jax.experimental.pallas import tpu as pltpu


def gelu_tanh(x):
    c = 0.7978845608028654  # sqrt(2/pi)
    return 0.5 * x * (1.0 + jnp.tanh(c * (x + 0.044715 * x * x * x)))


# ---------------------------------------------------------------------------
# Pallas kernel: one grid step processes a block of nb whole images, with
# channels on sublanes and nb*H*W pixels on lanes.
# ---------------------------------------------------------------------------
def acfb_kernel(x_ref, ij_ref, w0_ref, b0_ref, w1_ref, b1_ref,
                w2a_ref, w2b_ref, b2_ref, o_ref, *, H, W, shifts):
    x = x_ref[...]                                              # (C, L)

    # conv_0 (1x1) + GELU  ->  (hidden, L)
    h = gelu_tanh(jnp.dot(w0_ref[...], x,
                          preferred_element_type=jnp.float32) + b0_ref[...])

    p = w1_ref.shape[0]
    x1 = h[:p, :]                     # first p channels   (p, L)
    x2 = h[p:, :]                     # remaining channels (hidden - p, L)

    # Zero-padding validity masks, built in-kernel from per-lane (row, col)
    # indices.  A neighbor tap (ky, kx) is valid iff 0<=i+ky<H and 0<=j+kx<W;
    # this also kills any roll wrap across image / batch boundaries.
    i_idx = ij_ref[0:1, :]                                      # (1, L) f32
    j_idx = ij_ref[1:2, :]                                      # (1, L) f32
    row_ok = {-1: (i_idx >= 0.5).astype(jnp.float32),
              1: (i_idx <= H - 1.5).astype(jnp.float32)}
    col_ok = {-1: (j_idx >= 0.5).astype(jnp.float32),
              1: (j_idx <= W - 1.5).astype(jnp.float32)}

    # conv_1 (3x3, pad 1): im2col via 8 static lane rolls + edge masks,
    # then ONE matmul with K = 9*p.
    taps = []
    k = 0
    for ky in (-1, 0, 1):
        for kx in (-1, 0, 1):
            s = shifts[k]
            k += 1
            t = x1 if s == 0 else pltpu.roll(x1, s, axis=1)
            if ky != 0 and kx != 0:
                t = t * (row_ok[ky] * col_ok[kx])
            elif ky != 0:
                t = t * row_ok[ky]
            elif kx != 0:
                t = t * col_ok[kx]
            taps.append(t)
    cols = jnp.concatenate(taps, axis=0)                        # (9p, L)
    x1c = gelu_tanh(jnp.dot(w1_ref[...], cols,
                            preferred_element_type=jnp.float32) + b1_ref[...])

    # conv_2 (1x1) on cat([x1c, x2]) via split weight columns.
    out = (jnp.dot(w2a_ref[...], x1c, preferred_element_type=jnp.float32)
           + jnp.dot(w2b_ref[...], x2, preferred_element_type=jnp.float32)
           + b2_ref[...])
    o_ref[...] = out.astype(o_ref.dtype)


# ---------------------------------------------------------------------------
# Host-side glue
# ---------------------------------------------------------------------------
def make_shifts(H, W, L):
    """Lane-roll shift for each 3x3 tap: output[idx] = input[idx + ky*W + kx]."""
    shifts = []
    for ky in (-1, 0, 1):
        for kx in (-1, 0, 1):
            shifts.append(int((-(ky * W + kx)) % L))
    return tuple(shifts)


def acfb_forward_pallas(x_nchw, params, training=True):
    if not training:
        return x_nchw  # eval-mode forward is identity in the reference module

    N, C, H, W = x_nchw.shape
    HW = H * W
    w0, b0, w1, b1, w2, b2 = (params[k] for k in
                              ("w0", "b0", "w1", "b1", "w2", "b2"))
    hidden = w0.shape[0]
    p = w1.shape[0]
    dim = w2.shape[0]

    # Batch-block size: fold whole images into the lane axis (amortizes the
    # per-step pipeline overhead) while keeping the block lane width legal
    # (multiple of 128 unless it is the full array) and modest in size.
    cands = [d for d in range(1, N + 1)
             if N % d == 0 and d * HW <= (1 << 16)
             and (d == N or (d * HW) % 128 == 0)]
    nb = max(cands) if cands else N
    L = nb * HW

    # Layout: NCHW -> (C, N*H*W): channels on sublanes, pixels lane-dense.
    xf = jnp.transpose(x_nchw, (1, 0, 2, 3)).reshape(C, N * HW)

    # Per-lane (row, col) indices within an image, identical for every block.
    lane = jnp.arange(L, dtype=jnp.int32)
    pix = lane % HW
    ij = jnp.stack([pix // W, pix % W]).astype(jnp.float32)     # (2, L)

    shifts = make_shifts(H, W, L)

    # Parameter preprocessing (plain JAX glue, all tiny).
    w0m = w0.reshape(hidden, C)                                 # (hidden, C)
    b0r = b0.reshape(hidden, 1)
    # w1m[co, k*p + ci] = w1[co, ci, k//3, k%3]  (matches im2col row order)
    w1m = jnp.transpose(w1, (0, 2, 3, 1)).reshape(p, 9 * p)     # (p, 9p)
    b1r = b1.reshape(p, 1)
    w2m = w2.reshape(dim, hidden)                               # (dim, hidden)
    w2a = w2m[:, :p]                                            # (dim, p)
    w2b = w2m[:, p:]                                            # (dim, hidden-p)
    b2r = b2.reshape(dim, 1)

    const = lambda shape: pl.BlockSpec(shape, lambda i: tuple(0 for _ in shape))
    kernel = functools.partial(acfb_kernel, H=H, W=W, shifts=shifts)

    outf = pl.pallas_call(
        kernel,
        out_shape=jax.ShapeDtypeStruct((dim, N * HW), jnp.float32),
        grid=(N // nb,),
        in_specs=[
            pl.BlockSpec((C, L), lambda i: (0, i)),   # x block (nb images)
            const((2, L)),                            # per-lane (i, j) indices
            const((hidden, C)),                       # w0
            const((hidden, 1)),                       # b0
            const((p, 9 * p)),                        # w1 (im2col form)
            const((p, 1)),                            # b1
            const((dim, p)),                          # w2 cols for x1c
            const((dim, hidden - p)),                 # w2 cols for x2
            const((dim, 1)),                          # b2
        ],
        out_specs=pl.BlockSpec((dim, L), lambda i: (0, i)),
        compiler_params=pltpu.CompilerParams(
            dimension_semantics=("parallel",)),
    )(xf, ij, w0m, b0r, w1m, b1r, w2a, w2b, b2r)

    # Layout back: (dim, N*HW) -> NCHW
    return jnp.transpose(outf.reshape(dim, N, H, W), (1, 0, 2, 3))


# ---------------------------------------------------------------------------
# Pure-JAX reference (lax.conv, NCHW) for validation
# ---------------------------------------------------------------------------
def acfb_forward_ref(x, params):
    w0, b0, w1, b1, w2, b2 = (params[k] for k in
                              ("w0", "b0", "w1", "b1", "w2", "b2"))
    p = w1.shape[0]
    dn = ("NCHW", "OIHW", "NCHW")
    h = gelu_tanh(lax.conv_general_dilated(x, w0, (1, 1), "VALID",
                                           dimension_numbers=dn)
                  + b0[None, :, None, None])
    x1, x2 = h[:, :p], h[:, p:]
    x1 = gelu_tanh(lax.conv_general_dilated(x1, w1, (1, 1), ((1, 1), (1, 1)),
                                            dimension_numbers=dn)
                   + b1[None, :, None, None])
    y = jnp.concatenate([x1, x2], axis=1)
    return (lax.conv_general_dilated(y, w2, (1, 1), "VALID",
                                     dimension_numbers=dn)
            + b2[None, :, None, None])


if __name__ == "__main__":
    # module hyperparams (small, consistent with ACFB(dim=4))
    N, dim, H, W = 2, 4, 16, 16
    growth_rate, p_rate = 2.0, 0.25
    hidden = int(dim * growth_rate)        # 8
    p_dim = int(hidden * p_rate)           # 2

    key = jax.random.PRNGKey(0)
    ks = jax.random.split(key, 7)
    params = {
        "w0": jax.random.normal(ks[0], (hidden, dim, 1, 1), jnp.float32) * 0.1,
        "b0": jax.random.normal(ks[1], (hidden,), jnp.float32) * 0.1,
        "w1": jax.random.normal(ks[2], (p_dim, p_dim, 3, 3), jnp.float32) * 0.1,
        "b1": jax.random.normal(ks[3], (p_dim,), jnp.float32) * 0.1,
        "w2": jax.random.normal(ks[4], (dim, hidden, 1, 1), jnp.float32) * 0.1,
        "b2": jax.random.normal(ks[5], (dim,), jnp.float32) * 0.1,
    }
    x = jax.random.normal(ks[6], (N, dim, H, W), jnp.float32)

    out = jax.block_until_ready(acfb_forward_pallas(x, params, training=True))
    ref = jax.block_until_ready(acfb_forward_ref(x, params))
    err = float(jnp.max(jnp.abs(out - ref)))
    assert out.shape == (N, dim, H, W), out.shape
    assert err < 1e-4, f"max abs err {err}"
    print("KERNEL_OK")
</pallas_src>

<mosaic_0001>
module attributes {stable_mosaic.version = 11 : i64} {
  func.func @acfb_kernel(%arg0: i32, %arg1: memref<4x512xf32, #tpu.memory_space<vmem>>, %arg2: memref<2x512xf32, #tpu.memory_space<vmem>>, %arg3: memref<8x4xf32, #tpu.memory_space<vmem>>, %arg4: memref<8x1xf32, #tpu.memory_space<vmem>>, %arg5: memref<2x18xf32, #tpu.memory_space<vmem>>, %arg6: memref<2x1xf32, #tpu.memory_space<vmem>>, %arg7: memref<4x2xf32, #tpu.memory_space<vmem>>, %arg8: memref<4x6xf32, #tpu.memory_space<vmem>>, %arg9: memref<4x1xf32, #tpu.memory_space<vmem>>, %arg10: memref<4x512xf32, #tpu.memory_space<vmem>>) attributes {dimension_semantics = [#tpu.dimension_semantics<parallel>], iteration_bounds = array<i64: 1>, scalar_prefetch = 0 : i64, scratch_operands = 0 : i64, tpu.core_type = #tpu.core_type<tc>, window_params = [{transform_indices = @transform_0, window_bounds = array<i64: 4, 512>}, {pipeline_mode = #tpu.pipeline_mode<synchronous>, transform_indices = @transform_1, window_bounds = array<i64: 2, 512>}, {pipeline_mode = #tpu.pipeline_mode<synchronous>, transform_indices = @transform_2, window_bounds = array<i64: 8, 4>}, {pipeline_mode = #tpu.pipeline_mode<synchronous>, transform_indices = @transform_3, window_bounds = array<i64: 8, 1>}, {pipeline_mode = #tpu.pipeline_mode<synchronous>, transform_indices = @transform_4, window_bounds = array<i64: 2, 18>}, {pipeline_mode = #tpu.pipeline_mode<synchronous>, transform_indices = @transform_5, window_bounds = array<i64: 2, 1>}, {pipeline_mode = #tpu.pipeline_mode<synchronous>, transform_indices = @transform_6, window_bounds = array<i64: 4, 2>}, {pipeline_mode = #tpu.pipeline_mode<synchronous>, transform_indices = @transform_7, window_bounds = array<i64: 4, 6>}, {pipeline_mode = #tpu.pipeline_mode<synchronous>, transform_indices = @transform_8, window_bounds = array<i64: 4, 1>}, {transform_indices = @transform_9, window_bounds = array<i64: 4, 512>}]} {
    %c0 = arith.constant 0 : index
    %c0_0 = arith.constant 0 : index
    %0 = vector.load %arg1[%c0, %c0_0] : memref<4x512xf32, #tpu.memory_space<vmem>>, vector<4x512xf32>
    %c0_1 = arith.constant 0 : index
    %c0_2 = arith.constant 0 : index
    %1 = vector.load %arg3[%c0_1, %c0_2] : memref<8x4xf32, #tpu.memory_space<vmem>>, vector<8x4xf32>
    %cst = arith.constant dense<0.000000e+00> : vector<8x512xf32>
    %2 = tpu.matmul %1, %0, %cst {dimension_numbers = #tpu.dot_dimension_numbers<[1], [0], [0], [1], [0, 0, 1, 1], [], []>} : vector<8x4xf32>, vector<4x512xf32>, vector<8x512xf32> -> vector<8x512xf32>
    %c0_3 = arith.constant 0 : index
    %c0_4 = arith.constant 0 : index
    %3 = vector.load %arg4[%c0_3, %c0_4] : memref<8x1xf32, #tpu.memory_space<vmem>>, vector<8x1xf32>
    %4 = vector.broadcast %3 : vector<8x1xf32> to vector<8x512xf32>
    %5 = arith.addf %2, %4 : vector<8x512xf32>
    %cst_5 = arith.constant 5.000000e-01 : f32
    %6 = vector.broadcast %cst_5 : f32 to vector<8x512xf32>
    %7 = arith.mulf %6, %5 : vector<8x512xf32>
    %cst_6 = arith.constant 4.471500e-02 : f32
    %8 = vector.broadcast %cst_6 : f32 to vector<8x512xf32>
    %9 = arith.mulf %8, %5 : vector<8x512xf32>
    %10 = arith.mulf %9, %5 : vector<8x512xf32>
    %11 = arith.mulf %10, %5 : vector<8x512xf32>
    %12 = arith.addf %5, %11 : vector<8x512xf32>
    %cst_7 = arith.constant 0.797884583 : f32
    %13 = vector.broadcast %cst_7 : f32 to vector<8x512xf32>
    %14 = arith.mulf %13, %12 : vector<8x512xf32>
    %15 = math.tanh %14 : vector<8x512xf32>
    %cst_8 = arith.constant 1.000000e+00 : f32
    %16 = vector.broadcast %cst_8 : f32 to vector<8x512xf32>
    %17 = arith.addf %16, %15 : vector<8x512xf32>
    %18 = arith.mulf %7, %17 : vector<8x512xf32>
    %19 = vector.extract_strided_slice %18 {offsets = [0, 0], sizes = [2, 512], strides = [1, 1]} : vector<8x512xf32> to vector<2x512xf32>
    %20 = vector.extract_strided_slice %18 {offsets = [2, 0], sizes = [6, 512], strides = [1, 1]} : vector<8x512xf32> to vector<6x512xf32>
    %c0_9 = arith.constant 0 : index
    %c0_10 = arith.constant 0 : index
    %21 = vector.load %arg2[%c0_9, %c0_10] : memref<2x512xf32, #tpu.memory_space<vmem>>, vector<1x512xf32>
    %c1 = arith.constant 1 : index
    %c0_11 = arith.constant 0 : index
    %22 = vector.load %arg2[%c1, %c0_11] : memref<2x512xf32, #tpu.memory_space<vmem>>, vector<1x512xf32>
    %cst_12 = arith.constant 5.000000e-01 : f32
    %23 = vector.broadcast %cst_12 : f32 to vector<1x512xf32>
    %24 = arith.cmpf oge, %21, %23 : vector<1x512xf32>
    %25 = arith.extui %24 : vector<1x512xi1> to vector<1x512xi32>
    %26 = arith.sitofp %25 : vector<1x512xi32> to vector<1x512xf32>
    %cst_13 = arith.constant 1.450000e+01 : f32
    %27 = vector.broadcast %cst_13 : f32 to vector<1x512xf32>
    %28 = arith.cmpf ole, %21, %27 : vector<1x512xf32>
    %29 = arith.extui %28 : vector<1x512xi1> to vector<1x512xi32>
    %30 = arith.sitofp %29 : vector<1x512xi32> to vector<1x512xf32>
    %cst_14 = arith.constant 5.000000e-01 : f32
    %31 = vector.broadcast %cst_14 : f32 to vector<1x512xf32>
    %32 = arith.cmpf oge, %22, %31 : vector<1x512xf32>
    %33 = arith.extui %32 : vector<1x512xi1> to vector<1x512xi32>
    %34 = arith.sitofp %33 : vector<1x512xi32> to vector<1x512xf32>
    %cst_15 = arith.constant 1.450000e+01 : f32
    %35 = vector.broadcast %cst_15 : f32 to vector<1x512xf32>
    %36 = arith.cmpf ole, %22, %35 : vector<1x512xf32>
    %37 = arith.extui %36 : vector<1x512xi1> to vector<1x512xi32>
    %38 = arith.sitofp %37 : vector<1x512xi32> to vector<1x512xf32>
    %c17_i32 = arith.constant 17 : i32
    %39 = tpu.dynamic_rotate %19 by %c17_i32 dim 1 : vector<2x512xf32>, i32 -> vector<2x512xf32>
    %40 = arith.mulf %26, %34 : vector<1x512xf32>
    %41 = vector.broadcast %40 : vector<1x512xf32> to vector<2x512xf32>
    %42 = arith.mulf %39, %41 : vector<2x512xf32>
    %c16_i32 = arith.constant 16 : i32
    %43 = tpu.dynamic_rotate %19 by %c16_i32 dim 1 : vector<2x512xf32>, i32 -> vector<2x512xf32>
    %44 = vector.broadcast %26 : vector<1x512xf32> to vector<2x512xf32>
    %45 = arith.mulf %43, %44 : vector<2x512xf32>
    %c15_i32 = arith.constant 15 : i32
    %46 = tpu.dynamic_rotate %19 by %c15_i32 dim 1 : vector<2x512xf32>, i32 -> vector<2x512xf32>
    %47 = arith.mulf %26, %38 : vector<1x512xf32>
    %48 = vector.broadcast %47 : vector<1x512xf32> to vector<2x512xf32>
    %49 = arith.mulf %46, %48 : vector<2x512xf32>
    %c1_i32 = arith.constant 1 : i32
    %50 = tpu.dynamic_rotate %19 by %c1_i32 dim 1 : vector<2x512xf32>, i32 -> vector<2x512xf32>
    %51 = vector.broadcast %34 : vector<1x512xf32> to vector<2x512xf32>
    %52 = arith.mulf %50, %51 : vector<2x512xf32>
    %c511_i32 = arith.constant 511 : i32
    %53 = tpu.dynamic_rotate %19 by %c511_i32 dim 1 : vector<2x512xf32>, i32 -> vector<2x512xf32>
    %54 = vector.broadcast %38 : vector<1x512xf32> to vector<2x512xf32>
    %55 = arith.mulf %53, %54 : vector<2x512xf32>
    %c497_i32 = arith.constant 497 : i32
    %56 = tpu.dynamic_rotate %19 by %c497_i32 dim 1 : vector<2x512xf32>, i32 -> vector<2x512xf32>
    %57 = arith.mulf %30, %34 : vector<1x512xf32>
    %58 = vector.broadcast %57 : vector<1x512xf32> to vector<2x512xf32>
    %59 = arith.mulf %56, %58 : vector<2x512xf32>
    %c496_i32 = arith.constant 496 : i32
    %60 = tpu.dynamic_rotate %19 by %c496_i32 dim 1 : vector<2x512xf32>, i32 -> vector<2x512xf32>
    %61 = vector.broadcast %30 : vector<1x512xf32> to vector<2x512xf32>
    %62 = arith.mulf %60, %61 : vector<2x512xf32>
    %c495_i32 = arith.constant 495 : i32
    %63 = tpu.dynamic_rotate %19 by %c495_i32 dim 1 : vector<2x512xf32>, i32 -> vector<2x512xf32>
    %64 = arith.mulf %30, %38 : vector<1x512xf32>
    %65 = vector.broadcast %64 : vector<1x512xf32> to vector<2x512xf32>
    %66 = arith.mulf %63, %65 : vector<2x512xf32>
    %67 = tpu.concatenate %42, %45, %49, %52, %19, %55, %59, %62, %66 in 0 : vector<2x512xf32>, vector<2x512xf32>, vector<2x512xf32>, vector<2x512xf32>, vector<2x512xf32>, vector<2x512xf32>, vector<2x512xf32>, vector<2x512xf32>, vector<2x512xf32> -> vector<18x512xf32>
    %c0_16 = arith.constant 0 : index
    %c0_17 = arith.constant 0 : index
    %68 = vector.load %arg5[%c0_16, %c0_17] : memref<2x18xf32, #tpu.memory_space<vmem>>, vector<2x18xf32>
    %cst_18 = arith.constant dense<0.000000e+00> : vector<2x512xf32>
    %69 = tpu.matmul %68, %67, %cst_18 {dimension_numbers = #tpu.dot_dimension_numbers<[1], [0], [0], [1], [0, 0, 1, 1], [], []>} : vector<2x18xf32>, vector<18x512xf32>, vector<2x512xf32> -> vector<2x512xf32>
    %c0_19 = arith.constant 0 : index
    %c0_20 = arith.constant 0 : index
    %70 = vector.load %arg6[%c0_19, %c0_20] : memref<2x1xf32, #tpu.memory_space<vmem>>, vector<2x1xf32>
    %71 = vector.broadcast %70 : vector<2x1xf32> to vector<2x512xf32>
    %72 = arith.addf %69, %71 : vector<2x512xf32>
    %cst_21 = arith.constant 5.000000e-01 : f32
    %73 = vector.broadcast %cst_21 : f32 to vector<2x512xf32>
    %74 = arith.mulf %73, %72 : vector<2x512xf32>
    %cst_22 = arith.constant 4.471500e-02 : f32
    %75 = vector.broadcast %cst_22 : f32 to vector<2x512xf32>
    %76 = arith.mulf %75, %72 : vector<2x512xf32>
    %77 = arith.mulf %76, %72 : vector<2x512xf32>
    %78 = arith.mulf %77, %72 : vector<2x512xf32>
    %79 = arith.addf %72, %78 : vector<2x512xf32>
    %cst_23 = arith.constant 0.797884583 : f32
    %80 = vector.broadcast %cst_23 : f32 to vector<2x512xf32>
    %81 = arith.mulf %80, %79 : vector<2x512xf32>
    %82 = math.tanh %81 : vector<2x512xf32>
    %cst_24 = arith.constant 1.000000e+00 : f32
    %83 = vector.broadcast %cst_24 : f32 to vector<2x512xf32>
    %84 = arith.addf %83, %82 : vector<2x512xf32>
    %85 = arith.mulf %74, %84 : vector<2x512xf32>
    %c0_25 = arith.constant 0 : index
    %c0_26 = arith.constant 0 : index
    %86 = vector.load %arg7[%c0_25, %c0_26] : memref<4x2xf32, #tpu.memory_space<vmem>>, vector<4x2xf32>
    %cst_27 = arith.constant dense<0.000000e+00> : vector<4x512xf32>
    %87 = tpu.matmul %86, %85, %cst_27 {dimension_numbers = #tpu.dot_dimension_numbers<[1], [0], [0], [1], [0, 0, 1, 1], [], []>} : vector<4x2xf32>, vector<2x512xf32>, vector<4x512xf32> -> vector<4x512xf32>
    %c0_28 = arith.constant 0 : index
    %c0_29 = arith.constant 0 : index
    %88 = vector.load %arg8[%c0_28, %c0_29] : memref<4x6xf32, #tpu.memory_space<vmem>>, vector<4x6xf32>
    %cst_30 = arith.constant dense<0.000000e+00> : vector<4x512xf32>
    %89 = tpu.matmul %88, %20, %cst_30 {dimension_numbers = #tpu.dot_dimension_numbers<[1], [0], [0], [1], [0, 0, 1, 1], [], []>} : vector<4x6xf32>, vector<6x512xf32>, vector<4x512xf32> -> vector<4x512xf32>
    %90 = arith.addf %87, %89 : vector<4x512xf32>
    %c0_31 = arith.constant 0 : index
    %c0_32 = arith.constant 0 : index
    %91 = vector.load %arg9[%c0_31, %c0_32] : memref<4x1xf32, #tpu.memory_space<vmem>>, vector<4x1xf32>
    %92 = vector.broadcast %91 : vector<4x1xf32> to vector<4x512xf32>
    %93 = arith.addf %90, %92 : vector<4x512xf32>
    %c0_33 = arith.constant 0 : index
    %c0_34 = arith.constant 0 : index
    %94 = vector.load %arg10[%c0_33, %c0_34] : memref<4x512xf32, #tpu.memory_space<vmem>>, vector<4x512xf32>
    tpu.vector_store %arg10[%c0_33, %c0_34], %93 {strides = array<i32>} : memref<4x512xf32, #tpu.memory_space<vmem>>, vector<4x512xf32>,
    return
  }
  func.func @transform_0(%arg0: i32) -> (i32, i32) {
    %c0_i32 = arith.constant 0 : i32
    %c0_i32_0 = arith.constant 0 : i32
    return %c0_i32, %arg0 : i32, i32
  }
  func.func @transform_1(%arg0: i32) -> (i32, i32) {
    %c0_i32 = arith.constant 0 : i32
    %c0_i32_0 = arith.constant 0 : i32
    %c0_i32_1 = arith.constant 0 : i32
    return %c0_i32, %c0_i32_0 : i32, i32
  }
  func.func @transform_2(%arg0: i32) -> (i32, i32) {
    %c0_i32 = arith.constant 0 : i32
    %c0_i32_0 = arith.constant 0 : i32
    %c0_i32_1 = arith.constant 0 : i32
    return %c0_i32, %c0_i32_0 : i32, i32
  }
  func.func @transform_3(%arg0: i32) -> (i32, i32) {
    %c0_i32 = arith.constant 0 : i32
    %c0_i32_0 = arith.constant 0 : i32
    %c0_i32_1 = arith.constant 0 : i32
    return %c0_i32, %c0_i32_0 : i32, i32
  }
  func.func @transform_4(%arg0: i32) -> (i32, i32) {
    %c0_i32 = arith.constant 0 : i32
    %c0_i32_0 = arith.constant 0 : i32
    %c0_i32_1 = arith.constant 0 : i32
    return %c0_i32, %c0_i32_0 : i32, i32
  }
  func.func @transform_5(%arg0: i32) -> (i32, i32) {
    %c0_i32 = arith.constant 0 : i32
    %c0_i32_0 = arith.constant 0 : i32
    %c0_i32_1 = arith.constant 0 : i32
    return %c0_i32, %c0_i32_0 : i32, i32
  }
  func.func @transform_6(%arg0: i32) -> (i32, i32) {
    %c0_i32 = arith.constant 0 : i32
    %c0_i32_0 = arith.constant 0 : i32
    %c0_i32_1 = arith.constant 0 : i32
    return %c0_i32, %c0_i32_0 : i32, i32
  }
  func.func @transform_7(%arg0: i32) -> (i32, i32) {
    %c0_i32 = arith.constant 0 : i32
    %c0_i32_0 = arith.constant 0 : i32
    %c0_i32_1 = arith.constant 0 : i32
    return %c0_i32, %c0_i32_0 : i32, i32
  }
  func.func @transform_8(%arg0: i32) -> (i32, i32) {
    %c0_i32 = arith.constant 0 : i32
    %c0_i32_0 = arith.constant 0 : i32
    %c0_i32_1 = arith.constant 0 : i32
    return %c0_i32, %c0_i32_0 : i32, i32
  }
  func.func @transform_9(%arg0: i32) -> (i32, i32) {
    %c0_i32 = arith.constant 0 : i32
    %c0_i32_0 = arith.constant 0 : i32
    return %c0_i32, %arg0 : i32, i32
  }
}

</mosaic_0001>

<bundles_post_ra>
// kernel: tpu_custom_call.1
= control target key start
LH: loop header
LB: loop body
LE: loop exit
PB: predicated region body
PF: predicated region fallthrough
CT: control target
= control target key end

     0   :  { %v974_v2 = vmov 0   ;;  %s1408_s0 = inlined_call_operand.vmem [shape: f32[4,512], index: 0, kind: input, shape index: {}]   ;;  %s1409_s1 = inlined_call_operand.vmem [shape: f32[2,512], index: 1, kind: input, shape index: {}]   ;;  %s1410_s2 = inlined_call_operand.vmem [shape: f32[8,4], index: 2, kind: input, shape index: {}]   ;;  %s1411_s3 = inlined_call_operand.vmem [shape: f32[8,1], index: 3, kind: input, shape index: {}]   ;;  %s1412_s4 = inlined_call_operand.vmem [shape: f32[2,18], index: 4, kind: input, shape index: {}]   ;;  %s1413_s5 = inlined_call_operand.vmem [shape: f32[2,1], index: 5, kind: input, shape index: {}]   ;;  %s1414_s6 = inlined_call_operand.vmem [shape: f32[4,2], index: 6, kind: input, shape index: {}]   ;;  %s1415_s7 = inlined_call_operand.vmem [shape: f32[4,6], index: 7, kind: input, shape index: {}]   ;;  %s1416_s8 = inlined_call_operand.vmem [shape: f32[4,1], index: 8, kind: input, shape index: {}]   ;;  %s1417_s9 = inlined_call_operand.hbm [shape: f32[4,512], index: 9, kind: output, shape index: {}]  }
   0x1   :  { %v33_v0 = vld [vmem:[%s1408_s0] sm:$0xff]  ;;  %v34_v1 = vld [vmem:[%s1408_s0 + $0x8] sm:$0xff]  ;;  %930 = vset.pattern.permute.xlu0 %v974_v2  ;;  %931 = vset.pattern.permute.xlu1 %v974_v2 }
   0x2   :  { %44 = vst [vmem:[#allocation1] ss:$2 sm:$0xff] %v33_v0  ;;  %v36_v3 = vld [vmem:[%s1411_s3] sm:$0xff] }
   0x3   :  { %14 = vsyncpa [#allocation3], 0  ;;  %46 = vst [vmem:[#allocation1 + $0x10] ss:$2 sm:$0xff] %v34_v1  ;;  %39 = vperm.xlu0 %930, %v36_v3   ;;  %vm55_vm0 = vcmask 1043456   ;;  %v35_v4 = vld [vmem:[%s1410_s2] sm:$0xff]  ;;  %v203_v57 = vlaneseq }
   0x4   :  { %vm51_vm1 = vcmask 31744   ;;  %s975_s0 = smov 112   ;;  %s976_s2 = smov 113   ;;  %v508_v54 = vld [vmem:[%s1413_s5] sm:$0x3]  ;;  %v983_v2 = vmov 0.0  }
   0x5   :  { %s977_s3 = smov 127   ;;  %s978_s17 = smov 16   ;;  %v1132_v59 = vand.u32 127, %v203_v57  ;;  %v1140_v61 = vld [vmem:[%s1409_s1] ss:$2 sm:$0xf] }
   0x6   :  { %s979_s18 = smov 111   ;;  %s980_s19 = smov 15   ;;  %v890_v62 = vld [vmem:[%s1409_s1 + $0x1] ss:$2 sm:$0xf]  ;;  %vm186_vm3 = vcmp.le.f32.partialorder %v1140_v61, 14.5 }
   0x7   :  { %s981_s20 = smov 17   ;;  %s982_s21 = smov 1   ;;  %vm337_vm2 = vcmp.lt.s32.totalorder %v1132_v59, 113  ;;  %vm189_vm4 = vcmp.ge.f32.partialorder %v890_v62, 0.5  ;;  %v1149_v3 = vsel %vm186_vm3, 1.0, %v983_v2  ;;  %vm192_vm5 = vcmp.le.f32.partialorder %v890_v62, 14.5 }
   0x8   :  { %vm311_vm6 = vcmp.lt.s32.totalorder %v1132_v59, 127  ;;  %vm481_vm7 = vcmask 1041408   ;;  %vm390_vm8 = vcmp.lt.s32.totalorder %v1132_v59, 111  ;;  %vm364_vm9 = vcmp.lt.s32.totalorder %v1132_v59, 112  ;;  %s873_s13 = sshll.u32 %s1417_s9, 4  ;;  %s874_s13 = int_to_ptr.hbm [resolvable:$true] %s873_s13 }
   0x9   :  { %v47_v5 = vld.sshfl [vmem:[#allocation1] sm:$0xff pattern:$0x75316420]  ;;  %v48_v6 = vld.sshfl [vmem:[#allocation1 + $0x8] sm:$0xff pattern:$0x75316420] }
   0xa   :  { %882 = vmatpush.msk.msra.mxu0 %vm55_vm0, %v47_v5  ;;  %884 = vmatpush.msk.msra.mxu1 %vm55_vm0, %v48_v6  ;;  %v49_v7 = vld.sshfl [vmem:[#allocation1 + $0x10] sm:$0xff pattern:$0x75316420]  ;;  %v50_v8 = vld.sshfl [vmem:[#allocation1 + $0x18] sm:$0xff pattern:$0x75316420] }
   0xb   :  { %886 = vmatpush.msk.msra.mxu2 %vm55_vm0, %v49_v7  ;;  %888 = vmatpush.msk.msra.mxu3 %vm55_vm0, %v50_v8  ;;  %vm490_vm10 = vcmask 1045504   ;;  %vm183_vm11 = vcmp.ge.f32.partialorder %v1140_v61, 0.5  ;;  %vm232_vm12 = vcmp.lt.s32.totalorder %v1132_v59, 16  ;;  %vm205_vm13 = vcmp.lt.s32.totalorder %v1132_v59, 17 }
   0xc   :  { %883 = vmatmul.msk.f32.vlgmr.msra.gmra.mxu0 %vm51_vm1, %v35_v4  ;;  %885 = vmatmul.msk.f32.vlgmr.msra.gmra.mxu1 %vm51_vm1, %v35_v4  ;;  %vm258_vm14 = vcmp.lt.s32.totalorder %v1132_v59, 15  ;;  %vm285_vm15 = vcmp.lt.s32.totalorder %v1132_v59, 1  ;;  %vm748_vm3 = vcmask 15360  }
   0xd   :  { %887 = vmatmul.msk.f32.vlgmr.msra.gmra.mxu2 %vm51_vm1, %v35_v4  ;;  %889 = vmatmul.msk.f32.vlgmr.msra.gmra.mxu3 %vm51_vm1, %v35_v4  ;;  %v1151_v4 = vsel %vm189_vm4, 1.0, %v983_v2  ;;  %vm514_vm1 = vcmask 146432  }
   0xe   :  { %v1159_v7 = vmul.f32 %v1151_v4, %v1149_v3 }
  0x75   :  { %v40_v9 = vpop.permute.xlu0 %39 }
  0x89   :  { %v81_v10 = vpop.f32.mrf.mxu0  ;;  %v101_v11 = vpop.f32.mrf.mxu1 }
  0x8a   :  { %v82_v12 = vadd.f32 %v81_v10, %v40_v9  ;;  %v102_v13 = vadd.f32 %v101_v11, %v40_v9  ;;  %v344_v10 = vperm.slane %v1159_v7, 0 }
  0x8c   :  { %v148_v14 = vmul.f32 0.044715, %v82_v12  ;;  %v149_v15 = vmul.f32 0.044715, %v102_v13  ;;  %v144_v31 = vmul.f32 0.5, %v82_v12  ;;  %v145_v40 = vmul.f32 0.5, %v102_v13 }
  0x8e   :  { %v152_v16 = vmul.f32 %v148_v14, %v82_v12  ;;  %v153_v17 = vmul.f32 %v149_v15, %v102_v13 }
  0x90   :  { %v156_v18 = vmul.f32 %v152_v16, %v82_v12  ;;  %v157_v19 = vmul.f32 %v153_v17, %v102_v13  ;;  %v141_v20 = vpop.f32.mrf.mxu3  ;;  %v121_v27 = vpop.f32.mrf.mxu2 }
  0x91   :  { %v142_v23 = vadd.f32 %v141_v20, %v40_v9  ;;  %v122_v28 = vadd.f32 %v121_v27, %v40_v9  ;;  %v1163_v9 = vsel %vm192_vm5, 1.0, %v983_v2 }
  0x92   :  { %v160_v21 = vadd.f32 %v156_v18, %v82_v12  ;;  %v161_v22 = vadd.f32 %v157_v19, %v102_v13  ;;  %v317_v11 = vperm.slane %v1163_v9, 0  ;;  %v1189_v27 = vmul.f32 %v1163_v9, %v1149_v3 }
  0x93   :  { %v151_v26 = vmul.f32 0.044715, %v142_v23  ;;  %v150_v33 = vmul.f32 0.044715, %v122_v28  ;;  %v147_v48 = vmul.f32 0.5, %v142_v23  ;;  %v146_v52 = vmul.f32 0.5, %v122_v28 }
  0x94   :  { %v164_v24 = vmul.f32 0.7978846, %v160_v21  ;;  %v165_v25 = vmul.f32 0.7978846, %v161_v22  ;;  %v320_v21 = vperm.slane %v1163_v9, 3 }
  0x95   :  { %v155_v29 = vmul.f32 %v151_v26, %v142_v23  ;;  %v154_v37 = vmul.f32 %v150_v33, %v122_v28  ;;  %v373_v33 = vperm.slane %v1149_v3, 3 }
  0x96   :  { %932 = vtanh.f32 %v164_v24 }
  0x97   :  { %934 = vtanh.f32 %v165_v25  ;;  %v159_v34 = vmul.f32 %v155_v29, %v142_v23  ;;  %v158_v41 = vmul.f32 %v154_v37, %v122_v28  ;;  %v347_v29 = vperm.slane %v1159_v7, 3 }
  0x99   :  { %v163_v38 = vadd.f32 %v159_v34, %v142_v23  ;;  %v162_v44 = vadd.f32 %v158_v41, %v122_v28 }
  0x9b   :  { %v167_v42 = vmul.f32 0.7978846, %v163_v38  ;;  %v166_v45 = vmul.f32 0.7978846, %v162_v44 }
  0x9c   :  { %v933_v30 = vpop.eup %932 }
  0x9d   :  { %v172_v32 = vadd.f32 1.0, %v933_v30  ;;  %v935_v36 = vpop.eup %934  ;;  %936 = vtanh.f32 %v167_v42 }
  0x9e   :  { %v173_v39 = vadd.f32 1.0, %v935_v36  ;;  %938 = vtanh.f32 %v166_v45 }
  0x9f   :  { %v1051_v35 = vmul.f32 %v172_v32, %v144_v31  ;;  %v400_v31 = vperm.slane %v1189_v27, 3 }
  0xa0   :  { %v1059_v43 = vmul.f32 %v173_v39, %v145_v40 }
  0xa1   :  { %356 = vrot.lane.b32.xlu2 %v1051_v35, %s975_s0  ;;  %329 = vrot.lane.b32.xlu1 %v1051_v35, %s976_s2 }
  0xa2   :  { %303 = vrot.lane.b32.xlu0 %v1051_v35, %s977_s3 }
  0xa3   :  { %v937_v46 = vpop.eup %936 }
  0xa4   :  { %v175_v47 = vadd.f32 1.0, %v937_v46  ;;  %v939_v50 = vpop.eup %938 }
  0xa5   :  { %v174_v51 = vadd.f32 1.0, %v939_v50 }
  0xa6   :  { %v1073_v49 = vmul.f32 %v175_v47, %v147_v48 }
  0xa7   :  { %v1081_v53 = vmul.f32 %v174_v51, %v146_v52  ;;  %v1216_v52 = vsel %vm183_vm11, 1.0, %v983_v2 }
  0xa8   :  { %v1224_v57 = vmul.f32 %v1163_v9, %v1216_v52 }
  0xa9   :  { %226 = vrot.lane.b32.xlu2 %v1059_v43, %s978_s17  ;;  %382 = vrot.lane.b32.xlu1 %v1051_v35, %s979_s18 }
  0xaa   :  { %252 = vrot.lane.b32.xlu0 %v1059_v43, %s980_s19  ;;  %v268_v2 = vperm.slane %v1224_v57, 3 }
  0xb1   :  { %197 = vrot.lane.b32.xlu2 %v1059_v43, %s981_s20  ;;  %305 = vrot.lane.b32.xlu1 %v1059_v43, %s977_s3 }
  0xb2   :  { %279 = vrot.lane.b32.xlu0 %v1059_v43, %s982_s21 }
  0xb9   :  { %331 = vrot.lane.b32.xlu2 %v1059_v43, %s976_s2  ;;  %309 = vrot.lane.b32.xlu1 %v1073_v49, %s977_s3 }
  0xba   :  { %230 = vrot.lane.b32.xlu0 %v1073_v49, %s978_s17 }
  0xc1   :  { %335 = vrot.lane.b32.xlu2 %v1073_v49, %s976_s2  ;;  %307 = vrot.lane.b32.xlu1 %v1081_v53, %s977_s3 }
  0xc2   :  { %362 = vrot.lane.b32.xlu0 %v1073_v49, %s975_s0 }
  0xc9   :  { %228 = vrot.lane.b32.xlu2 %v1081_v53, %s978_s17  ;;  %254 = vrot.lane.b32.xlu1 %v1081_v53, %s980_s19 }
  0xca   :  { %333 = vrot.lane.b32.xlu0 %v1081_v53, %s976_s2 }
  0xd1   :  { %256 = vrot.lane.b32.xlu2 %v1073_v49, %s980_s19  ;;  %201 = vrot.lane.b32.xlu1 %v1073_v49, %s981_s20 }
  0xd2   :  { %199 = vrot.lane.b32.xlu0 %v1081_v53, %s981_s20 }
  0xd9   :  { %388 = vrot.lane.b32.xlu2 %v1073_v49, %s979_s18  ;;  %283 = vrot.lane.b32.xlu1 %v1073_v49, %s982_s21 }
  0xda   :  { %281 = vrot.lane.b32.xlu0 %v1081_v53, %s982_s21 }
  0xe1   :  { %360 = vrot.lane.b32.xlu2 %v1081_v53, %s975_s0  ;;  %386 = vrot.lane.b32.xlu1 %v1081_v53, %s979_s18 }
  0xe2   :  { %224 = vrot.lane.b32.xlu0 %v1051_v35, %s978_s17 }
  0xe9   :  { %250 = vrot.lane.b32.xlu2 %v1051_v35, %s980_s19  ;;  %358 = vrot.lane.b32.xlu1 %v1059_v43, %s975_s0 }
  0xea   :  { %384 = vrot.lane.b32.xlu0 %v1059_v43, %s979_s18 }
  0xf1   :  { %277 = vrot.lane.b32.xlu2 %v1051_v35, %s982_s21  ;;  %195 = vrot.lane.b32.xlu1 %v1051_v35, %s981_s20 }
  0xf2   :  { %511 = vperm.xlu0 %930, %v508_v54   ;;  %v1220_v54 = vmul.f32 %v1151_v4, %v1216_v52 }
  0xfb   :  { %v1126_v55 = vpop.permute.xlu2 %356 }
 0x103   :  { %v1128_v56 = vpop.permute.xlu2 %226 }
 0x10b   :  { %v1130_v58 = vpop.permute.xlu2 %197 }
 0x113   :  { %v1135_v60 = vpop.permute.xlu2 %331  ;;  %v330_v63 = vpop.permute.xlu1 %329 }
 0x114   :  { %v340_v0 = vsel %vm337_vm2, %v330_v63, %v1135_v60  ;;  %v304_v1 = vpop.permute.xlu0 %303 }
 0x115   :  { %v352_v14 = vmul.f32 %v344_v10, %v340_v0 }
 0x117   :  { %v461_v19 = vrot.slane %v352_v14, 4  ;;  %v319_v14 = vperm.slane %v1163_v9, 2 }
 0x11b   :  { %v1153_v5 = vpop.permute.xlu2 %335  ;;  %v1155_v6 = vpop.permute.xlu1 %382 }
 0x11c   :  { %v1161_v8 = vpop.permute.xlu0 %252  ;;  %v341_v30 = vsel %vm337_vm2, %v1153_v5, %v330_v63  ;;  %v241_v63 = vperm.slane %v1216_v52, 3 }
 0x11d   :  { %v355_v34 = vmul.f32 %v347_v29, %v341_v30  ;;  %v294_v29 = vperm.slane %v1151_v4, 3  ;;  %v318_v30 = vperm.slane %v1163_v9, 1 }
 0x11f   :  { %v464_v45 = vrot.slane %v355_v34, 4  ;;  %v267_v34 = vperm.slane %v1224_v57, 2 }
 0x123   :  { %v229_v12 = vpop.permute.xlu2 %228  ;;  %v1168_v13 = vpop.permute.xlu1 %305 }
 0x124   :  { %v314_v15 = vsel %vm311_vm6, %v304_v1, %v1168_v13  ;;  %v1173_v16 = vpop.permute.xlu0 %279 }
 0x125   :  { %v325_v17 = vmul.f32 %v317_v11, %v314_v15 }
 0x127   :  { %v449_v18 = vrot.slane %v325_v17, 6  ;;  %v240_v17 = vperm.slane %v1216_v52, 2 }
 0x129   :  { %v495_v20 = vsel %vm481_vm7, %v1051_v35, %v449_v18  ;;  %v234_v18 = vsel %vm232_vm12, %v1128_v56, %v229_v12 }
 0x12a   :  { %v1179_v22 = vsel %vm55_vm0, %v495_v20, %v461_v19 }
 0x12b   :  { %v1181_v23 = vpop.permute.xlu2 %256  ;;  %v310_v24 = vpop.permute.xlu1 %309 }
 0x12c   :  { %v315_v25 = vsel %vm311_vm6, %v310_v24, %v304_v1  ;;  %v1185_v26 = vpop.permute.xlu0 %230  ;;  %v215_v1 = vperm.slane %v1220_v54, 3 }
 0x12d   :  { %v328_v28 = vmul.f32 %v320_v21, %v315_v25  ;;  %v233_v61 = vsel %vm232_vm12, %v229_v12, %v1185_v26  ;;  %v346_v21 = vperm.slane %v1159_v7, 2 }
 0x12e   :  { %v249_v11 = vmul.f32 %v241_v63, %v233_v61 }
 0x12f   :  { %v452_v32 = vrot.slane %v328_v28, 6 }
 0x131   :  { %v498_v44 = vsel %vm481_vm7, %v1073_v49, %v452_v32 }
 0x132   :  { %v502_v47 = vsel %vm55_vm0, %v498_v44, %v464_v45  ;;  %v293_v44 = vperm.slane %v1151_v4, 2 }
 0x133   :  { %v1199_v36 = vpop.permute.xlu2 %388  ;;  %v308_v37 = vpop.permute.xlu1 %307 }
 0x134   :  { %v394_v38 = vsel %vm390_vm8, %v1199_v36, %v1155_v6  ;;  %v363_v39 = vpop.permute.xlu0 %362  ;;  %v312_v19 = vsel %vm311_vm6, %v308_v37, %v310_v24  ;;  %v416_v24 = vrot.slane %v249_v11, 6 }
 0x135   :  { %v408_v40 = vmul.f32 %v400_v31, %v394_v38  ;;  %v368_v41 = vsel %vm364_vm9, %v363_v39, %v1126_v55  ;;  %v327_v32 = vmul.f32 %v319_v14, %v312_v19 }
 0x136   :  { %v381_v42 = vmul.f32 %v373_v33, %v368_v41  ;;  %v372_v33 = vperm.slane %v1149_v3, 2 }
 0x137   :  { %901 = vmatpush.msk.msrb.mxu3 %vm481_vm7, %v408_v40  ;;  %v248_v40 = vmul.f32 %v240_v17, %v234_v18  ;;  %v451_v61 = vrot.slane %v327_v32, 6 }
 0x138   :  { %v476_v46 = vrot.slane %v381_v42, 2  ;;  %v214_v42 = vperm.slane %v1220_v54, 2 }
 0x13a   :  { %v506_v48 = vsel %vm490_vm10, %v502_v47, %v476_v46  ;;  %v313_v47 = vsel %vm311_vm6, %v1168_v13, %v308_v37  ;;  %v399_v13 = vperm.slane %v1189_v27, 2  ;;  %v1290_v37 = vld [vmem:[%s1412_s4] sm:$0x3] }
 0x13b   :  { %604 = vmatpush.msrb.mxu3 %v506_v48  ;;  %v255_v50 = vpop.permute.xlu1 %254  ;;  %v1250_v20 = vpop.permute.xlu2 %360  ;;  %v326_v18 = vmul.f32 %v318_v30, %v313_v47  ;;  %v497_v30 = vsel %vm481_vm7, %v1081_v53, %v451_v61 }
 0x13c   :  { %v1213_v51 = vpop.permute.xlu0 %333  ;;  %v259_v15 = vsel %vm258_vm14, %v255_v50, %v1181_v23 }
 0x13d   :  { %v338_v25 = vsel %vm337_vm2, %v1213_v51, %v1153_v5  ;;  %v276_v12 = vmul.f32 %v268_v2, %v259_v15  ;;  %v365_v5 = vsel %vm364_vm9, %v1250_v20, %v363_v39  ;;  %v260_v2 = vsel %vm258_vm14, %v1161_v8, %v255_v50 }
 0x13e   :  { %v354_v41 = vmul.f32 %v346_v21, %v338_v25  ;;  %v275_v19 = vmul.f32 %v267_v34, %v260_v2  ;;  %v345_v50 = vperm.slane %v1159_v7, 1  ;;  %v339_v7 = vsel %vm337_vm2, %v1135_v60, %v1213_v51 }
 0x13f   :  { %v428_v48 = vrot.slane %v276_v12, 4  ;;  %v266_v60 = vperm.slane %v1224_v57, 1  ;;  %v370_v51 = vperm.slane %v1149_v3, 0  ;;  %vm656_vm2 = vcmask 48128  }
 0x140   :  { %v463_v11 = vrot.slane %v354_v41, 4  ;;  %v265_v41 = vperm.slane %v1224_v57, 0  ;;  %v239_v57 = vperm.slane %v1216_v52, 1 }
 0x143   :  { %v1226_v62 = vpop.permute.xlu1 %201  ;;  %v251_v21 = vpop.permute.xlu2 %250 }
 0x144   :  { %v200_v0 = vpop.permute.xlu0 %199 }
 0x145   :  { %v206_v10 = vsel %vm205_vm13, %v200_v0, %v1226_v62  ;;  %v207_v39 = vsel %vm205_vm13, %v1130_v58, %v200_v0 }
 0x146   :  { %v223_v28 = vmul.f32 %v215_v1, %v206_v10  ;;  %v380_v1 = vmul.f32 %v372_v33, %v365_v5  ;;  %v222_v0 = vmul.f32 %v214_v42, %v207_v39  ;;  %v353_v5 = vmul.f32 %v345_v50, %v339_v7 }
 0x147   :  { %v654_v42 = vrot.slane %v1081_v53, 2  ;;  %v398_v39 = vperm.slane %v1189_v27, 1  ;;  %v238_v53 = vperm.slane %v1216_v52, 0 }
 0x148   :  { %v485_v46 = vsel %vm481_vm7, %v223_v28, %v416_v24  ;;  %v655_v28 = vrot.slane %v1073_v49, 2  ;;  %v475_v12 = vrot.slane %v380_v1, 2  ;;  %v501_v49 = vsel %vm55_vm0, %v497_v30, %v463_v11 }
 0x149   :  { %v489_v14 = vsel %vm55_vm0, %v485_v46, %v428_v48  ;;  %v292_v46 = vperm.slane %v1151_v4, 1  ;;  %v397_v48 = vperm.slane %v1189_v27, 0  ;;  %v462_v1 = vrot.slane %v353_v5, 4 }
 0x14b   :  { %v1260_v31 = vpop.permute.xlu1 %283  ;;  %v278_v52 = vpop.permute.xlu2 %277 }
 0x14c   :  { %v282_v38 = vpop.permute.xlu0 %281 }
 0x14d   :  { %v286_v9 = vsel %vm285_vm15, %v282_v38, %v1260_v31  ;;  %v287_v63 = vsel %vm285_vm15, %v1173_v16, %v282_v38  ;;  %v450_v38 = vrot.slane %v326_v18, 6  ;;  %v261_v18 = vsel %vm258_vm14, %v251_v21, %v1161_v8 }
 0x14e   :  { %v302_v45 = vmul.f32 %v294_v29, %v286_v9  ;;  %v301_v15 = vmul.f32 %v293_v44, %v287_v63  ;;  %v415_v29 = vrot.slane %v248_v40, 6  ;;  %v427_v40 = vrot.slane %v275_v19, 4 }
 0x14f   :  { %v505_v9 = vsel %vm490_vm10, %v501_v49, %v475_v12  ;;  %v371_v44 = vperm.slane %v1149_v3, 1  ;;  %v291_v63 = vperm.slane %v1151_v4, 0  ;;  %v496_v3 = vsel %vm481_vm7, %v1059_v43, %v450_v38 }
 0x150   :  { %v440_v10 = vrot.slane %v302_v45, 2  ;;  %v439_v34 = vrot.slane %v301_v15, 2  ;;  %v212_v4 = vperm.slane %v1220_v54, 0  ;;  %v500_v8 = vsel %vm55_vm0, %v496_v3, %v462_v1 }
 0x151   :  { %v274_v12 = vmul.f32 %v266_v60, %v261_v18  ;;  %v653_v60 = vrot.slane %v1059_v43, 2  ;;  %v646_v18 = vld [vmem:[%s1414_s6] sm:$0xf]  ;;  %s984_s6 = smov [#allocation2]  }
 0x152   :  { %v494_v17 = vsel %vm490_vm10, %v489_v14, %v440_v10  ;;  %s871_s10 = sshll.u32 %s984_s6, 4  ;;  %s872_s10 = int_to_ptr.vmem [resolvable:$true] %s871_s10 }
 0x153   :  { %605 = vmatpush.msrb.mxu3 %v494_v17  ;;  %v387_v25 = vpop.permute.xlu1 %386 }
 0x154   :  { %v391_v24 = vsel %vm390_vm8, %v387_v25, %v1199_v36  ;;  %902 = vmatmul.msk.f32.vlgmr.msrb.gmra.mxu3 %vm514_vm1, %v1290_v37  ;;  %v225_v32 = vpop.permute.xlu0 %224  ;;  %v484_v36 = vsel %vm481_vm7, %v222_v0, %v415_v29 }
 0x155   :  { %v407_v33 = vmul.f32 %v399_v13, %v391_v24  ;;  %909 = vmatpush.msk.msra.mxu3 %vm490_vm10, %v655_v28  ;;  %v488_v45 = vsel %vm55_vm0, %v484_v36, %v427_v40  ;;  %v236_v0 = vsel %vm232_vm12, %v1185_v26, %v225_v32  ;;  %v289_v26 = vsel %vm285_vm15, %v1260_v31, %v278_v52 }
 0x156   :  { %v493_v47 = vsel %vm490_vm10, %v488_v45, %v439_v34  ;;  %v246_v28 = vmul.f32 %v238_v53, %v236_v0  ;;  %v299_v24 = vmul.f32 %v291_v63, %v289_v26  ;;  %v426_v36 = vrot.slane %v274_v12, 4 }
 0x157   :  { %899 = vmatpush.msk.msrb.mxu2 %vm481_vm7, %v407_v33 }
 0x158   :  { %v413_v7 = vrot.slane %v246_v28, 6  ;;  %v437_v40 = vrot.slane %v299_v24, 2 }
 0x159   :  { %584 = vmatpush.msrb.mxu2 %v505_v9 }
 0x15b   :  { %v359_v61 = vpop.permute.xlu1 %358  ;;  %585 = vmatpush.msrb.mxu2 %v493_v47 }
 0x15c   :  { %v366_v2 = vsel %vm364_vm9, %v359_v61, %v1250_v20  ;;  %v367_v27 = vsel %vm364_vm9, %v1126_v55, %v359_v61  ;;  %v385_v10 = vpop.permute.xlu0 %384  ;;  %900 = vmatmul.msk.f32.vlgmr.msrb.gmra.mxu2 %vm514_vm1, %v1290_v37  ;;  %v235_v55 = vsel %vm232_vm12, %v225_v32, %v1128_v56  ;;  %v288_v56 = vsel %vm285_vm15, %v278_v52, %v1173_v16 }
 0x15d   :  { %v378_v11 = vmul.f32 %v370_v51, %v367_v27  ;;  %v379_v14 = vmul.f32 %v371_v44, %v366_v2  ;;  %v392_v13 = vsel %vm390_vm8, %v385_v10, %v387_v25  ;;  %v393_v20 = vsel %vm390_vm8, %v1155_v6, %v385_v10  ;;  %907 = vmatpush.msk.msra.mxu2 %vm490_vm10, %v654_v42  ;;  %v647_v51 = vld [vmem:[%s1415_s7] sm:$0xf] }
 0x15e   :  { %v405_v15 = vmul.f32 %v397_v48, %v393_v20  ;;  %v406_v17 = vmul.f32 %v398_v39, %v392_v13  ;;  %v262_v6 = vsel %vm258_vm14, %v1181_v23, %v251_v21  ;;  %v213_v25 = vperm.slane %v1220_v54, 1  ;;  %910 = vmatmul.msk.f32.vlgmr.msra.gmra.mxu3 %vm656_vm2, %v647_v51 }
 0x15f   :  { %v473_v19 = vrot.slane %v378_v11, 2  ;;  %v474_v50 = vrot.slane %v379_v14, 2  ;;  %v247_v23 = vmul.f32 %v239_v57, %v235_v55  ;;  %v273_v16 = vmul.f32 %v265_v41, %v262_v6  ;;  %v844_v57 = vld [vmem:[%s1416_s8] sm:$0xf] }
 0x160   :  { %895 = vmatpush.msk.msrb.mxu0 %vm481_vm7, %v405_v15  ;;  %897 = vmatpush.msk.msrb.mxu1 %vm481_vm7, %v406_v17  ;;  %v300_v31 = vmul.f32 %v292_v46, %v288_v56 }
 0x161   :  { %v503_v21 = vsel %vm490_vm10, %v1179_v22, %v473_v19  ;;  %v504_v29 = vsel %vm490_vm10, %v500_v8, %v474_v50  ;;  %v414_v33 = vrot.slane %v247_v23, 6  ;;  %v425_v34 = vrot.slane %v273_v16, 4  ;;  %847 = vperm.xlu1 %931, %v844_v57  }
 0x162   :  { %544 = vmatpush.msrb.mxu0 %v503_v21  ;;  %564 = vmatpush.msrb.mxu1 %v504_v29  ;;  %v438_v38 = vrot.slane %v300_v31, 2 }
 0x163   :  { %v196_v32 = vpop.permute.xlu1 %195 }
 0x164   :  { %v208_v30 = vsel %vm205_vm13, %v196_v32, %v1130_v58  ;;  %v209_v54 = vsel %vm205_vm13, %v1226_v62, %v196_v32  ;;  %v652_v62 = vrot.slane %v1051_v35, 2  ;;  %908 = vmatmul.msk.f32.vlgmr.msra.gmra.mxu2 %vm656_vm2, %v647_v51  ;;  %v512_v35 = vpop.permute.xlu0 %511 }
 0x165   :  { %v220_v22 = vmul.f32 %v212_v4, %v209_v54  ;;  %v221_v49 = vmul.f32 %v213_v25, %v208_v30 }
 0x167   :  { %v482_v5 = vsel %vm481_vm7, %v220_v22, %v413_v7  ;;  %v483_v41 = vsel %vm481_vm7, %v221_v49, %v414_v33 }
 0x168   :  { %v486_v9 = vsel %vm55_vm0, %v482_v5, %v425_v34  ;;  %v487_v58 = vsel %vm55_vm0, %v483_v41, %v426_v36 }
 0x169   :  { %v491_v42 = vsel %vm490_vm10, %v486_v9, %v437_v40  ;;  %v492_v59 = vsel %vm490_vm10, %v487_v58, %v438_v38 }
 0x16a   :  { %545 = vmatpush.msrb.mxu0 %v491_v42  ;;  %565 = vmatpush.msrb.mxu1 %v492_v59 }
 0x16b   :  { %896 = vmatmul.msk.f32.vlgmr.msrb.gmra.mxu0 %vm514_vm1, %v1290_v37  ;;  %898 = vmatmul.msk.f32.vlgmr.msrb.gmra.mxu1 %vm514_vm1, %v1290_v37 }
 0x16c   :  { %903 = vmatpush.msk.msra.mxu0 %vm490_vm10, %v652_v62  ;;  %905 = vmatpush.msk.msra.mxu1 %vm490_vm10, %v653_v60 }
 0x173   :  { %906 = vmatmul.msk.f32.vlgmr.msra.gmra.mxu1 %vm656_vm2, %v647_v51  ;;  %904 = vmatmul.msk.f32.vlgmr.msra.gmra.mxu0 %vm656_vm2, %v647_v51 }
 0x1d3   :  { %v848_v38 = vpop.permute.xlu1 %847 }
 0x1d7   :  { %v607_v43 = vpop.f32.mrf.mxu3 }
 0x1d8   :  { %v608_v44 = vadd.f32 %v607_v43, %v512_v35 }
 0x1da   :  { %v617_v45 = vmul.f32 0.044715, %v608_v44  ;;  %v613_v20 = vmul.f32 0.5, %v608_v44 }
 0x1dc   :  { %v621_v46 = vmul.f32 %v617_v45, %v608_v44 }
 0x1de   :  { %v625_v47 = vmul.f32 %v621_v46, %v608_v44 }
 0x1df   :  { %v587_v37 = vpop.f32.mrf.mxu2 }
 0x1e0   :  { %v629_v48 = vadd.f32 %v625_v47, %v608_v44  ;;  %v588_v39 = vadd.f32 %v587_v37, %v512_v35 }
 0x1e1   :  { %v745_v7 = vpop.f32.mrf.mxu3 }
 0x1e2   :  { %v633_v63 = vmul.f32 0.7978846, %v629_v48  ;;  %v616_v53 = vmul.f32 0.044715, %v588_v39  ;;  %v612_v8 = vmul.f32 0.5, %v588_v39 }
 0x1e4   :  { %940 = vtanh.f32 %v633_v63  ;;  %v620_v61 = vmul.f32 %v616_v53, %v588_v39 }
 0x1e6   :  { %v624_v3 = vmul.f32 %v620_v61, %v588_v39 }
 0x1e7   :  { %v725_v33 = vpop.f32.mrf.mxu2 }
 0x1e8   :  { %v628_v1 = vadd.f32 %v624_v3, %v588_v39  ;;  %v547_v2 = vpop.f32.mrf.mxu0  ;;  %v567_v27 = vpop.f32.mrf.mxu1 }
 0x1e9   :  { %v548_v10 = vadd.f32 %v547_v2, %v512_v35  ;;  %v568_v4 = vadd.f32 %v567_v27, %v512_v35 }
 0x1ea   :  { %v941_v52 = vpop.eup %940  ;;  %v632_v11 = vmul.f32 0.7978846, %v628_v1 }
 0x1eb   :  { %v614_v14 = vmul.f32 0.044715, %v548_v10  ;;  %v615_v13 = vmul.f32 0.044715, %v568_v4  ;;  %v641_v55 = vadd.f32 1.0, %v941_v52  ;;  %v610_v12 = vmul.f32 0.5, %v548_v10 }
 0x1ec   :  { %942 = vtanh.f32 %v632_v11  ;;  %v611_v24 = vmul.f32 0.5, %v568_v4 }
 0x1ed   :  { %v618_v0 = vmul.f32 %v614_v14, %v548_v10  ;;  %v619_v15 = vmul.f32 %v615_v13, %v568_v4  ;;  %v645_v17 = vmul.f32 %v641_v55, %v613_v20 }
 0x1ef   :  { %v622_v6 = vmul.f32 %v618_v0, %v548_v10  ;;  %v623_v19 = vmul.f32 %v619_v15, %v568_v4  ;;  %917 = vmatpush.msk.msrb.mxu3 %vm481_vm7, %v645_v17 }
 0x1f0   :  { %918 = vmatmul.msk.f32.vlgmr.msrb.gmra.mxu3 %vm748_vm3, %v646_v18  ;;  %v685_v22 = vpop.f32.mrf.mxu0  ;;  %v705_v34 = vpop.f32.mrf.mxu1 }
 0x1f1   :  { %v626_v50 = vadd.f32 %v622_v6, %v548_v10  ;;  %v627_v56 = vadd.f32 %v623_v19, %v568_v4 }
 0x1f2   :  { %v943_v26 = vpop.eup %942 }
 0x1f3   :  { %v630_v25 = vmul.f32 0.7978846, %v626_v50  ;;  %v631_v28 = vmul.f32 0.7978846, %v627_v56  ;;  %v640_v23 = vadd.f32 1.0, %v943_v26 }
 0x1f5   :  { %944 = vtanh.f32 %v630_v25  ;;  %v644_v21 = vmul.f32 %v640_v23, %v612_v8 }
 0x1f6   :  { %946 = vtanh.f32 %v631_v28 }
 0x1f7   :  { %915 = vmatpush.msk.msrb.mxu2 %vm481_vm7, %v644_v21 }
 0x1f8   :  { %916 = vmatmul.msk.f32.vlgmr.msrb.gmra.mxu2 %vm748_vm3, %v646_v18 }
 0x1fb   :  { %v945_v29 = vpop.eup %944 }
 0x1fc   :  { %v947_v16 = vpop.eup %946  ;;  %v638_v31 = vadd.f32 1.0, %v945_v29 }
 0x1fd   :  { %v639_v32 = vadd.f32 1.0, %v947_v16 }
 0x1fe   :  { %v642_v30 = vmul.f32 %v638_v31, %v610_v12 }
 0x1ff   :  { %v643_v54 = vmul.f32 %v639_v32, %v611_v24 }
 0x200   :  { %911 = vmatpush.msk.msrb.mxu0 %vm481_vm7, %v642_v30 }
 0x201   :  { %913 = vmatpush.msk.msrb.mxu1 %vm481_vm7, %v643_v54  ;;  %912 = vmatmul.msk.f32.vlgmr.msrb.gmra.mxu0 %vm748_vm3, %v646_v18 }
 0x202   :  { %914 = vmatmul.msk.f32.vlgmr.msrb.gmra.mxu1 %vm748_vm3, %v646_v18 }
 0x273   :  { %v841_v49 = vpop.f32.mrf.mxu3 }
 0x274   :  { %v842_v36 = vadd.f32 %v841_v49, %v745_v7 }
 0x276   :  { %v853_v40 = vadd.f32 %v848_v38, %v842_v36 }
 0x278   :  { %v859_v9 = vrot.slane %v853_v40, 4 }
 0x27b   :  { %v821_v5 = vpop.f32.mrf.mxu2 }
 0x27c   :  { %v822_v41 = vadd.f32 %v821_v5, %v725_v33 }
 0x27e   :  { %v781_v58 = vpop.f32.mrf.mxu0  ;;  %v852_v42 = vadd.f32 %v848_v38, %v822_v41 }
 0x27f   :  { %v801_v59 = vpop.f32.mrf.mxu1  ;;  %v782_v60 = vadd.f32 %v781_v58, %v685_v22 }
 0x280   :  { %v802_v62 = vadd.f32 %v801_v59, %v705_v34  ;;  %v861_v51 = vsel %vm55_vm0, %v852_v42, %v859_v9 }
 0x281   :  { %865 = vst [vmem:[#allocation2 + $0x8] sm:$0xff] %v861_v51  ;;  %v850_v44 = vadd.f32 %v848_v38, %v782_v60 }
 0x282   :  { %v851_v35 = vadd.f32 %v848_v38, %v802_v62 }
 0x284   :  { %v858_v43 = vrot.slane %v851_v35, 4 }
 0x286   :  { %v860_v45 = vsel %vm55_vm0, %v850_v44, %v858_v43 }
 0x287   :  { %864 = vst [vmem:[#allocation2] sm:$0xff] %v860_v45 }
 0x288   :  { %876 = dma.vmem_to_hbm [thread:$0]  %s872_s10, 256, %s874_s13, [#allocation3]  }
 0x289   :  { %972 = dma.done.wait [#allocation3], 256  }
 0x28a   :  { %973 = vsyncadd [#allocation3], 4294967040 }
 0x28b   :  { %881 = vsyncpa [#allocation3], 1 }

</bundles_post_ra>
